<compile_context>
chip_gen: v7x
topology: tpu7x:2x2x1
jax: 0.10.0
libtpu: 0.0.40
codegen_flags: <defaults>
</compile_context>

<pallas_src>
import math

import jax
import jax.numpy as jnp
from jax import lax
from jax.experimental import pallas as pl
from jax.experimental.pallas import tpu as pltpu


def _round_up(x: int, m: int) -> int:
    return (x + m - 1) // m * m


# --------------------------------------------------------------------------
# Kernels
# --------------------------------------------------------------------------
def _onehot_kernel(x_ref, o_ref):
    # x_ref: (tile, 1) int32 indices; o_ref: (tile, C) one-hot output.
    classes = lax.broadcasted_iota(jnp.int32, (1, o_ref.shape[-1]), 1)
    o_ref[...] = (x_ref[...] == classes).astype(o_ref.dtype)


def _onehot_packed_kernel(x_ref, r_ref, cls_ref, o_ref):
    # Lane-dense path: k consecutive rows folded into the lane axis.
    #   x_ref:   (tile, k)   int32 indices of k consecutive rows per kernel-row.
    #   r_ref:   (k, k*C)    bf16 replication matrix, R[g, j] = (j // C == g).
    #   cls_ref: (1, k*C)    bf16 class pattern, cls[j] = j % C (precomputed).
    #   o_ref:   (tile, k*C) lane j holds (group row j // C, class j % C).
    # rep[i, j] = x[i, j // C]; the MXU does the lane replication and the
    # result stays bf16 (exact: indices < 256 and a single nonzero term per
    # dot), so there is no f32 intermediate spilling to VMEM.
    rep = jnp.dot(x_ref[...].astype(jnp.bfloat16), r_ref[...],
                  preferred_element_type=jnp.bfloat16)
    o_ref[...] = (rep == cls_ref[...]).astype(o_ref.dtype)


# --------------------------------------------------------------------------
# Tiling / compiler-param helpers
# --------------------------------------------------------------------------
def _compiler_params():
    try:
        phys = int(pltpu.get_tpu_info().vmem_capacity_bytes)
        limit = max(32 * 1024 * 1024,
                    min(phys - 16 * 1024 * 1024, 48 * 1024 * 1024))
    except Exception:
        limit = 32 * 1024 * 1024
    return pltpu.CompilerParams(
        dimension_semantics=("parallel",),
        vmem_limit_bytes=limit,
    )


def _pick_tile_rows(n_rows: int, per_row_bytes: int, budget_bytes: int) -> int:
    # Size the row tile from the per-row VMEM footprint.
    if n_rows <= 8:
        return max(n_rows, 1)          # block == full array dim (legal).
    tile = max(32, (budget_bytes // max(per_row_bytes, 1)) // 32 * 32)
    # Keep >= 2 grid steps so the "parallel" row grid can shard across v7x's
    # two TensorCores (harmless extra step on single-TC v5e/v6e).
    tile = min(tile, _round_up((n_rows + 1) // 2, 8))
    return int(max(tile, 8))


# --------------------------------------------------------------------------
# pallas_call wrappers
# --------------------------------------------------------------------------
def _simple_onehot(x_rows, c, dtype, budget_bytes, compiler_params):
    # x_rows: (n,) int32 -> (n, C). Masked stores when C is not lane-dense;
    # only used for C > 256 or the tiny (< k rows) ragged tail.
    n = x_rows.shape[0]
    out_itemsize = jnp.dtype(dtype).itemsize
    per_row = 128 * 4 + _round_up(c, 128) * out_itemsize
    tile = _pick_tile_rows(n, per_row, budget_bytes)
    return pl.pallas_call(
        _onehot_kernel,
        out_shape=jax.ShapeDtypeStruct((n, c), dtype),
        grid_spec=pltpu.PrefetchScalarGridSpec(
            num_scalar_prefetch=0,
            grid=(pl.cdiv(n, tile),),
            in_specs=[pl.BlockSpec((tile, 1), lambda i: (i, 0))],
            out_specs=pl.BlockSpec((tile, c), lambda i: (i, 0)),
        ),
        compiler_params=compiler_params,
    )(x_rows.reshape(n, 1))


def _packed_onehot(x_rows, c, k, dtype, budget_bytes, compiler_params):
    # x_rows: (n,) int32 with n % k == 0 -> (n, C), via lane-dense (tile, k*C)
    # output blocks (k*C is a multiple of 128 -> unmasked vst).
    n = x_rows.shape[0]
    n_rows, w = n // k, k * c
    out_itemsize = jnp.dtype(dtype).itemsize
    # Per-row VMEM: int32 indices + output block + bf16 rep intermediate.
    per_row = _round_up(k, 128) * 4 + w * out_itemsize + w * 2
    tile = _pick_tile_rows(n_rows, per_row, budget_bytes)

    lane = jnp.arange(w, dtype=jnp.int32)
    repl = (lane[None, :] // c ==
            jnp.arange(k, dtype=jnp.int32)[:, None]).astype(jnp.bfloat16)
    cls = (lane % c).astype(jnp.bfloat16).reshape(1, w)

    out = pl.pallas_call(
        _onehot_packed_kernel,
        out_shape=jax.ShapeDtypeStruct((n_rows, w), dtype),
        grid_spec=pltpu.PrefetchScalarGridSpec(
            num_scalar_prefetch=0,
            grid=(pl.cdiv(n_rows, tile),),
            in_specs=[pl.BlockSpec((tile, k), lambda i: (i, 0)),
                      pl.BlockSpec((k, w), lambda i: (0, 0)),   # resident
                      pl.BlockSpec((1, w), lambda i: (0, 0))],  # resident
            out_specs=pl.BlockSpec((tile, w), lambda i: (i, 0)),
        ),
        compiler_params=compiler_params,
    )(x_rows.reshape(n_rows, k), repl, cls)
    # (n_rows, k*C) is bit-identical row-major memory to (n, C).
    return out.reshape(n, c)


def one_hot_encode(x: jax.Array, num_classes: int, *, dtype=jnp.int8,
                   vmem_block_budget_bytes: int = 12 * 1024 * 1024) -> jax.Array:
    """Pallas equivalent of F.one_hot(x, num_classes) (out-of-range -> zero row)."""
    c = int(num_classes)
    if c <= 0:
        raise ValueError("num_classes must be positive")
    orig_shape = x.shape
    x_flat = jnp.asarray(x).reshape(-1).astype(jnp.int32)
    n = x_flat.shape[0]
    if n == 0:
        return jnp.zeros((*orig_shape, c), dtype)

    compiler_params = _compiler_params()

    # Lane-dense packing factor: fold k rows into the lane axis so k*C is a
    # multiple of 128. bf16 index replication is exact for indices < 256, so
    # the packed path is valid for any C <= 256.
    k = 128 // math.gcd(c, 128)
    if c <= 256 and k > 1 and n >= k:
        n_bulk = (n // k) * k
        bulk = _packed_onehot(x_flat[:n_bulk], c, k, dtype,
                              vmem_block_budget_bytes, compiler_params)
        if n_bulk == n:
            out2d = bulk
        else:
            # Ragged tail: one tiny (< k rows) simple-path call instead of
            # losing lane density on the whole array.
            tail = _simple_onehot(x_flat[n_bulk:], c, dtype,
                                  vmem_block_budget_bytes, compiler_params)
            out2d = jnp.concatenate([bulk, tail], axis=0)
    else:
        # Large C (already lane-dense-ish, or > 256 so bf16 trick is unsafe).
        out2d = _simple_onehot(x_flat, c, dtype,
                               vmem_block_budget_bytes, compiler_params)
    return out2d.reshape(*orig_shape, c)


if __name__ == "__main__":
    num_classes = 10
    key = jax.random.PRNGKey(0)
    k1, k2, k3 = jax.random.split(key, 3)

    # Small input (n < packing factor k): exercises the simple fallback path.
    x_small = jax.random.randint(k1, (2, 8), minval=0, maxval=num_classes,
                                 dtype=jnp.int32)
    y_small = jax.block_until_ready(one_hot_encode(x_small, num_classes))
    ref_small = jax.nn.one_hot(x_small, num_classes, dtype=y_small.dtype)
    assert y_small.shape == (2, 8, num_classes), y_small.shape
    assert jnp.array_equal(y_small, ref_small), "one-hot mismatch (simple path)"

    # Flattened length divisible by k (64 for C=10): exercises the lane-dense
    # packed path (output blocks are (tile, 640), unmasked stores).
    x_big = jax.random.randint(k2, (8, 128), minval=0, maxval=num_classes,
                               dtype=jnp.int32)
    y_big = jax.block_until_ready(one_hot_encode(x_big, num_classes))
    ref_big = jax.nn.one_hot(x_big, num_classes, dtype=y_big.dtype)
    assert y_big.shape == (8, 128, num_classes), y_big.shape
    assert jnp.array_equal(y_big, ref_big), "one-hot mismatch (packed path)"

    # Ragged flattened length (n % k != 0): packed bulk + tiny tail call,
    # with an explicit int32 output dtype.
    x_rag = jax.random.randint(k3, (3, 30), minval=0, maxval=num_classes,
                               dtype=jnp.int32)
    y_rag = jax.block_until_ready(
        one_hot_encode(x_rag, num_classes, dtype=jnp.int32))
    ref_rag = jax.nn.one_hot(x_rag, num_classes, dtype=jnp.int32)
    assert y_rag.shape == (3, 30, num_classes), y_rag.shape
    assert jnp.array_equal(y_rag, ref_rag), "one-hot mismatch (ragged path)"

    print("KERNEL_OK")
</pallas_src>

<mosaic_0001>
module attributes {stable_mosaic.version = 11 : i64} {
  func.func @_onehot_kernel(%arg0: i32, %arg1: memref<8x1xi32, #tpu.memory_space<vmem>>, %arg2: memref<8x10xi8, #tpu.memory_space<vmem>>) attributes {dimension_semantics = [#tpu.dimension_semantics<parallel>], iteration_bounds = array<i64: 2>, scalar_prefetch = 0 : i64, scratch_operands = 0 : i64, tpu.core_type = #tpu.core_type<tc>, window_params = [{transform_indices = @transform_0, window_bounds = array<i64: 8, 1>}, {transform_indices = @transform_1, window_bounds = array<i64: 8, 10>}]} {
    %0 = tpu.iota {dimensions = array<i32: 1>} : vector<1x10xi32>
    %c0 = arith.constant 0 : index
    %c0_0 = arith.constant 0 : index
    %1 = vector.load %arg1[%c0, %c0_0] : memref<8x1xi32, #tpu.memory_space<vmem>>, vector<8x1xi32>
    %2 = vector.broadcast %1 : vector<8x1xi32> to vector<8x10xi32>
    %3 = vector.broadcast %0 : vector<1x10xi32> to vector<8x10xi32>
    %4 = arith.cmpi eq, %2, %3 : vector<8x10xi32>
    %5 = arith.extui %4 : vector<8x10xi1> to vector<8x10xi8>
    %c0_1 = arith.constant 0 : index
    %c0_2 = arith.constant 0 : index
    %6 = vector.load %arg2[%c0_1, %c0_2] : memref<8x10xi8, #tpu.memory_space<vmem>>, vector<8x10xi8>
    tpu.vector_store %arg2[%c0_1, %c0_2], %5 {strides = array<i32>} : memref<8x10xi8, #tpu.memory_space<vmem>>, vector<8x10xi8>,
    return
  }
  func.func @transform_0(%arg0: i32) -> (i32, i32) {
    %c0_i32 = arith.constant 0 : i32
    %c0_i32_0 = arith.constant 0 : i32
    return %arg0, %c0_i32 : i32, i32
  }
  func.func @transform_1(%arg0: i32) -> (i32, i32) {
    %c0_i32 = arith.constant 0 : i32
    %c0_i32_0 = arith.constant 0 : i32
    return %arg0, %c0_i32 : i32, i32
  }
}

</mosaic_0001>

<bundles_post_ra>
// kernel: tpu_custom_call.1
= control target key start
LH: loop header
LB: loop body
LE: loop exit
PB: predicated region body
PF: predicated region fallthrough
CT: control target
= control target key end

     0   :  { %6 = vsyncpa [#allocation3], 0  ;;  %s426_s0 = inlined_call_operand.vmem [shape: s32[16,1], index: 0, kind: input, shape index: {}]   ;;  %s427_s1 = inlined_call_operand.hbm [shape: s8[16,10], index: 1, kind: output, shape index: {}]  }
   0x1   :  { %8 = vsyncpa [#allocation3 + $0x1], 0  ;;  %s326_s6 = smov 0   ;;  %s328_s7 = smov 0  }
   0x2   :  { %s330_s8 = smov 0   ;;  %s332_s9 = smov 0  }
   0x3 LB: > { %s347_s10 = sadd.s32 4294967295, %s312_s9   ;;  %s199_s11 = sadd.s32 4294967294, %s312_s9   ;;  %s312_s9 = sphi %s332_s9, %s433_s9   ;;  %s308_s8 = sphi %s330_s8, %s432_s8   ;;  %s304_s7 = sphi %s328_s7, %s431_s7   ;;  %s300_s6 = sphi %s326_s6, %s430_s6  }
   0x4   : > { %s351_s12 = sadd.s32 1, %s312_s9   ;;  %s47_s13 = sadd.s32 1, %s308_s8 }
   0x5   : > { %s44_s14 = ssub.s32 %s312_s9, %s351_s12  ;;  %p57_p0 = scmp.ne.s32.totalorder %s308_s8, %s304_s7 }
   0x6   : > { %p45_p1 = scmp.eq.s32.totalorder %s44_s14, 0  ;;  %p58_p2 = scmp.eq.s32.totalorder %s347_s10, 1 }
   0x7   : > { %p63_p3 = scmp.ne.s32.totalorder %s304_s7, %s300_s6  ;;  %p64_p4 = scmp.eq.s32.totalorder %s199_s11, 1 }
   0x8   : > { %s362_s15 = scalar_select %p45_p1, %s308_s8, %s47_s13  }
   0x9   : > { %p364_p5 = por %p58_p2, %p57_p0  ;;  %p368_p6 = por %p64_p4, %p63_p3 }
   0xa   : > { %p202_p7 = scmp.ge.s32.totalorder %s312_s9, 1  ;;  %p89_p8 = scmp.lt.s32.totalorder %s312_s9, 3 }
   0xc   : > { %p90_p9 = pnand %p202_p7, %p89_p8 }
   0xd   : > { %p108_p10 = scmp.lt.s32.totalorder (!%p90_p9), %s347_s10, 1  ;;  %v314_v0 = vmov (!%p90_p9), 0   ;;  %s105_s23 = sand.u32 (!%p90_p9), 1, %s304_s7   ;;  %v114_v2 = vlaneseq (!%p90_p9)  ;;  %vm124_vm2 = vcmask (!%p90_p9), 74752  }
   0xe   : > { %93 = sbr.rel (%p90_p9) target bundleno = 172 (0xac), region = 24  ;;  %249 = vset.pattern.permute.xlu0 (!%p90_p9), %v314_v0  ;;  %s203_s24 = sshll.u32 (!%p90_p9), %s105_s23, 1 }
   0xf   : > { %v115_v3 = vand.u32 (!%p90_p9), 127, %v114_v2  ;;  %s206_s25 = sshll.u32 (!%p90_p9), %s347_s10, 5  ;;  %s107_s26 = scalar_lea.vmem (!%p90_p9), [#allocation2], %s203_s24 }
  0x10   : > { %s140_s27 = sshll.u32 (!%p90_p9), %s107_s26, 4  ;;  %s384_s30 = scalar_lea.hbm (!%p90_p9), %s427_s1, %s206_s25  ;;  %s386_s27 = int_to_ptr.vmem [resolvable:$true] %s140_s27 }
  0x11   : > { %s127_s2 = scalar_lea.sflag (!%p90_p9), [#allocation3], %s105_s23  ;;  %s250_s3 = scalar_lea.vmem (!%p90_p9), %s386_s27, 32 }
  0x12   : > { %p251_p11 = scmp.ne.s32.totalorder (!%p90_p9), %s386_s27, %s250_s3  ;;  %s315_s4 = smov (!%p90_p9), [#allocation2]  }
  0x13   : > { %s254_s5 = sshll.u32 (!%p90_p9), %s315_s4, 4  ;;  %s255_s5 = int_to_ptr.vmem [resolvable:$false] %s254_s5 }
  0x14   : > { %p252_p12 = pnand (!%p90_p9), %p251_p11, %p364_p5  ;;  %p257_p0 = scmp.lt.s32.totalorder (!%p90_p9), %s386_s27, %s255_s5 }
  0x15   : > { %s109_s18 = scalar_select %p108_p10, %s347_s10, 1 }
  0x16   : > { %p253_p13 = pneg %p252_p12  ;;  %s256_s10 = scalar_lea.vmem %s255_s5, 64 }
  0x17   : > { %s204_s19 = sshll.u32 %s109_s18, 3  ;;  %p258_p1 = scmp.lt.s32.totalorder %s256_s10, %s250_s3 }
  0x18   : > { %s111_s22 = scalar_lea.vmem %s426_s0, %s204_s19 }
  0x19   : > { %v116_v1 = vld [vmem:[%s111_s22] sm:$0xff]  ;;  %p259_p2 = por %p258_p1, %p257_p0 }
  0x1a   : > { %118 = vperm.xlu0 %249, %v116_v1  }
  0x1b   : > { %p260_p3 = pnand %p259_p2, %p253_p13 }
  0x99   : > { %v119_v4 = vpop.permute.xlu0 %118 }
  0x9a   : > { %vm120_vm0 = vcmp.eq.s32.totalorder %v119_v4, %v115_v3 }
  0x9b   : > { %vm121_vm1 = vmpackc.low %vm120_vm0, %vm120_vm0 }
  0x9c   : > { %vm122_vm3 = vmpackc.even %vm121_vm1, %vm121_vm1 }
  0x9d   : > { %v123_v5 = vsel %vm122_vm3, 16843009, %v314_v0 }
  0x9e   : > { %125 = vst.msk [vmem:[%s107_s26] sm:$0x3] %vm124_vm2, %v123_v5 }
  0x9f   : > { %263 = shalt.err (!%p260_p3)
}
  0xa0   : > { %s264_s11 = scalar_lea.hbm %s384_s30, 32  ;;  %s268_s18 = scalar_lea.hbm %s427_s1, 64 }
  0xa1   : > { %p265_p4 = scmp.ne.s32.totalorder %s384_s30, %s264_s11  ;;  %p269_p9 = scmp.lt.u32.totalorder %s384_s30, %s427_s1 }
  0xa2   : > { %p270_p10 = scmp.lt.u32.totalorder %s268_s18, %s264_s11  ;;  %p272_p12 = scmp.lt.u32.totalorder %s264_s11, %s384_s30 }
  0xa3   : > { %p266_p7 = pnand %p265_p4, %p364_p5 }
  0xa4   : > { %p271_p11 = por %p270_p10, %p269_p9 }
  0xa5   : > { %p267_p8 = pneg %p266_p7 }
  0xa6   : > { %p273_p13 = por %p272_p12, %p271_p11 }
  0xa8   : > { %p274_p0 = pnand %p273_p13, %p267_p8 }
  0xaa   : > { %277 = shalt.err (!%p274_p0)
}
  0xab   : > { %209 = dma.vmem_to_hbm [thread:$0]  (%p364_p5), %s386_s27, 32, %s384_s30, %s127_s2  }
  0xac PF: > { %p215_p1 = scmp.ge.s32.totalorder %s312_s9, 2  ;;  %s152_s21 = sand.u32 1, %s300_s6  }
  0xad   : > { %s153_s22 = scalar_lea.sflag [#allocation3], %s152_s21 }
  0xae   : > { %p212_p2 = pnand %p215_p1, %p368_p6 }
  0xb0   : > { %295 = dma.done.wait (!%p212_p2), %s153_s22, 32  }
  0xb1   : > { %297 = vsyncadd (!%p212_p2), %s153_s22, 4294967264  ;;  %p11_p3 = scmp.ge.s32.totalorder %s351_s12, 4   ;;  %s430_s6 = smov %s304_s7 }
  0xb2   : > { %s431_s7 = smov %s308_s8  ;;  %s432_s8 = smov %s362_s15 }
  0xb3   : > { %s433_s9 = smov %s351_s12  ;;  %13 = sbr.rel (!%p11_p3) target bundleno = 3 (0x3), region = 59 }
  0xba   :  { %158 = vsyncpa [#allocation3], 1 }
  0xbb   :  { %160 = vsyncpa [#allocation3 + $0x1], 1 }

</bundles_post_ra>
